<compile_context>
chip_gen: v5e
topology: v5e:2x2
jax: 0.10.0
libtpu: 0.0.40
codegen_flags: <defaults>
</compile_context>

<pallas_src>
import jax
import jax.numpy as jnp
from jax.experimental import pallas as pl
from jax.experimental.pallas import tpu as pltpu


# Target bytes per tile for the row-stripe path (~4 MiB of f32).
_TILE_BYTES = 4 << 20


def _relu_kernel(a_ref, o_ref):
    # One tile of the adjacency parameter: relu + (no-op or fused) cast.
    o_ref[...] = jnp.maximum(a_ref[...], 0).astype(o_ref.dtype)


def graph_global_forward(A, idx=None):
    """forward(idx) = relu(A).  `idx` is accepted but unused (as in torch)."""
    n, m = A.shape
    itemsize = jnp.dtype(A.dtype).itemsize
    total_bytes = n * m * itemsize
    out_shape = jax.ShapeDtypeStruct((n, m), A.dtype)

    # ---- Fast path: small parameter (the real module is nnodes=16). -------
    # One full-array block (block dims == array dims satisfies the (8,128)
    # rule), grid=(1,): no padding, no per-step overhead, 1 read + 1 write.
    if total_bytes <= _TILE_BYTES or n < 8:
        return pl.pallas_call(
            _relu_kernel,
            out_shape=out_shape,
            grid=(1,),
            in_specs=[pl.BlockSpec((n, m), lambda i: (0, 0))],
            out_specs=pl.BlockSpec((n, m), lambda i: (0, 0)),
        )(A)

    # ---- Large path: full-width row stripes. -------------------------------
    # Last dim of the block is the full array width m (full-dim exception, so
    # no lane padding even when m % 128 != 0); rows are tiled in multiples of
    # 8 sized to ~_TILE_BYTES per tile. The last grid step may be ragged in
    # rows; Pallas masks its writeback, and no reduction over the tile is done
    # so any unspecified out-of-bounds input lanes are harmless.
    row_bytes = m * itemsize
    tm = (_TILE_BYTES // max(row_bytes, 1)) // 8 * 8
    tm = max(8, min(tm, (n // 8) * 8))
    grid = (pl.cdiv(n, tm),)

    return pl.pallas_call(
        _relu_kernel,
        out_shape=out_shape,
        grid=grid,
        in_specs=[pl.BlockSpec((tm, m), lambda i: (i, 0))],
        out_specs=pl.BlockSpec((tm, m), lambda i: (i, 0)),
        compiler_params=pltpu.CompilerParams(
            # Independent row stripes -> megacore sharding on v7x, harmless on
            # single-TC v5e/v6e.
            dimension_semantics=("parallel",),
            # 2 in + 2 out double buffers at ~4 MiB each ≈ 16 MiB; 48 MiB
            # leaves headroom and stays under v7x's 64 MiB per-TC VMEM while
            # being far below v5e/v6e physical (128 MiB).
            vmem_limit_bytes=48 << 20,
        ),
    )(A)


if __name__ == "__main__":
    # Small shapes consistent with the module ctor: nnodes=16, k=4, dim=32, alpha=3.
    nnodes, k, dim, alpha = 16, 4, 32, 3.0

    key = jax.random.PRNGKey(0)
    # nn.Parameter(torch.randn(nnodes, nnodes)) equivalent.
    A = jax.random.normal(key, (nnodes, nnodes), jnp.float32)
    # forward(idx) ignores idx; pass it anyway to mirror the torch signature.
    idx = jnp.arange(nnodes, dtype=jnp.int32)

    adj = graph_global_forward(A, idx)
    adj = jax.block_until_ready(adj)

    # Pure-JAX reference.
    adj_ref = jnp.maximum(A, 0.0)

    assert adj.shape == (nnodes, nnodes)
    assert adj.dtype == jnp.float32
    assert jnp.allclose(adj, adj_ref, atol=0.0), "mismatch vs relu reference"
    assert bool(jnp.all(adj >= 0.0))

    # Also exercise the large row-stripe path once (ragged last block) to make
    # sure it compiles and matches the reference.
    big_n = 2000  # not a multiple of 8 -> ragged last row stripe
    A_big = jax.random.normal(jax.random.PRNGKey(1), (big_n, big_n), jnp.float32)
    adj_big = jax.block_until_ready(graph_global_forward(A_big))
    assert adj_big.shape == (big_n, big_n)
    assert jnp.allclose(adj_big, jnp.maximum(A_big, 0.0), atol=0.0)

    print("KERNEL_OK")
</pallas_src>

<mosaic_0001>
module attributes {stable_mosaic.version = 11 : i64} {
  func.func @_relu_kernel(%arg0: i32, %arg1: memref<16x16xf32, #tpu.memory_space<vmem>>, %arg2: memref<16x16xf32, #tpu.memory_space<vmem>>) attributes {dimension_semantics = [#tpu.dimension_semantics<arbitrary>], iteration_bounds = array<i64: 1>, scalar_prefetch = 0 : i64, scratch_operands = 0 : i64, tpu.core_type = #tpu.core_type<tc>, window_params = [{pipeline_mode = #tpu.pipeline_mode<synchronous>, transform_indices = @transform_0, window_bounds = array<i64: 16, 16>}, {pipeline_mode = #tpu.pipeline_mode<synchronous>, transform_indices = @transform_1, window_bounds = array<i64: 16, 16>}]} {
    %c0 = arith.constant 0 : index
    %c0_0 = arith.constant 0 : index
    %0 = vector.load %arg1[%c0, %c0_0] : memref<16x16xf32, #tpu.memory_space<vmem>>, vector<16x16xf32>
    %cst = arith.constant 0.000000e+00 : f32
    %1 = vector.broadcast %cst : f32 to vector<16x16xf32>
    %2 = arith.maximumf %0, %1 : vector<16x16xf32>
    %c0_1 = arith.constant 0 : index
    %c0_2 = arith.constant 0 : index
    %3 = vector.load %arg2[%c0_1, %c0_2] : memref<16x16xf32, #tpu.memory_space<vmem>>, vector<16x16xf32>
    tpu.vector_store %arg2[%c0_1, %c0_2], %2 {strides = array<i32>} : memref<16x16xf32, #tpu.memory_space<vmem>>, vector<16x16xf32>,
    return
  }
  func.func @transform_0(%arg0: i32) -> (i32, i32) {
    %c0_i32 = arith.constant 0 : i32
    %c0_i32_0 = arith.constant 0 : i32
    %c0_i32_1 = arith.constant 0 : i32
    return %c0_i32, %c0_i32_0 : i32, i32
  }
  func.func @transform_1(%arg0: i32) -> (i32, i32) {
    %c0_i32 = arith.constant 0 : i32
    %c0_i32_0 = arith.constant 0 : i32
    %c0_i32_1 = arith.constant 0 : i32
    return %c0_i32, %c0_i32_0 : i32, i32
  }
}

</mosaic_0001>

<bundles_post_ra>
// kernel: tpu_custom_call.1
= control target key start
LH: loop header
LB: loop body
LE: loop exit
PB: predicated region body
PF: predicated region fallthrough
CT: control target
= control target key end

     0   :  { %6 = vsyncpa [#allocation3], 0  ;;  %s127_s0 = inlined_call_operand.hbm [shape: f32[16,16], index: 0, kind: input, shape index: {}]   ;;  %s128_s1 = inlined_call_operand.hbm [shape: f32[16,16], index: 1, kind: output, shape index: {}]  }
   0x1   :  { %7 = vsyncpa [#allocation4], 0  ;;  %s12_s8 = sshll.u32 %s127_s0, 4  ;;  %s107_s9 = smov [#allocation2]   ;;  %s13_s8 = int_to_ptr.hbm [resolvable:$true] %s12_s8 }
   0x2   :  { %s14_s10 = sshll.u32 %s107_s9, 4  ;;  %s108_s11 = smov 128   ;;  %s15_s10 = int_to_ptr.vmem [resolvable:$true] %s14_s10 }
   0x3   :  { %s109_s12 = smov 8  }
   0x4   :  { %20 = dma.hbm_to_vmem [thread:$0]  %s13_s8, 256, %s15_s10, [#allocation3], %s108_s11, %s108_s11, %s109_s12  }
   0x5   :  { %103 = dma.done.wait [#allocation3], 256  }
   0x6   :  { %104 = vsyncadd [#allocation3], 4294967040  ;;  %s110_s13 = smov [#allocation5]   ;;  %s38_s17 = sshll.u32 %s128_s1, 4  ;;  %v25_v0 = vld [vmem:[#allocation2] sm:$0xff]  ;;  %vm29_vm0 = vcmask 130048   ;;  %s39_s17 = int_to_ptr.hbm [resolvable:$true] %s38_s17 }
   0x7   :  { %s36_s14 = sshll.u32 %s110_s13, 4  ;;  %v26_v1 = vld [vmem:[#allocation2 + $0x8] sm:$0xff]  ;;  %v27_v2 = vmax.f32 %v25_v0, 0.0  ;;  %s37_s14 = int_to_ptr.vmem [resolvable:$true] %s36_s14 }
   0x8   :  { %v28_v3 = vmax.f32 %v26_v1, 0.0 }
   0x9   :  { %30 = vst.msk [vmem:[#allocation5] sm:$0xff] %vm29_vm0, %v27_v2 }
   0xa   :  { %31 = vst.msk [vmem:[#allocation5 + $0x8] sm:$0xff] %vm29_vm0, %v28_v3 }
   0xb   :  { %44 = dma.vmem_to_hbm [thread:$0]  %s37_s14, 256, %s39_s17, [#allocation4], %s108_s11, %s108_s11, %s109_s12  }
   0xc   :  { %105 = dma.done.wait [#allocation4], 256  }
   0xd   :  { %106 = vsyncadd [#allocation4], 4294967040 }
   0xe   :  { %49 = vsyncpa [#allocation3], 1 }
   0xf   :  { %50 = vsyncpa [#allocation4], 1 }

</bundles_post_ra>
